<compile_context>
chip_gen: v7x
topology: tpu7x:2x2x1
jax: 0.10.0
libtpu: 0.0.40
codegen_flags: <defaults>
</compile_context>

<pallas_src>
import numpy as np
import jax
import jax.numpy as jnp
from jax.experimental import pallas as pl
from jax.experimental.pallas import tpu as pltpu


def _length_regulator_kernel(x_ref, starts_ref, ends_ref, total_ref, out_ref):
    # x_ref:      (1, Tp, Dp)     VMEM, x dtype   (current batch element, resident)
    # starts_ref: (1, 1, Tp)      VMEM, int32     (exclusive prefix sum of durations)
    # ends_ref:   (1, 1, Tp)      VMEM, int32     (inclusive prefix sum of durations)
    # total_ref:  (B,)            SMEM, int32     (per-batch total expanded length)
    # out_ref:    (1, TILE_M, Dp) VMEM, x dtype
    b = pl.program_id(0)
    m = pl.program_id(1)
    tile_m = out_ref.shape[1]
    Tp = starts_ref.shape[-1]
    tile_start = m * tile_m
    total = total_ref[b]

    # Tile lies entirely in the zero-padded tail: skip all vector/MXU work.
    @pl.when(tile_start >= total)
    def _():
        out_ref[...] = jnp.zeros_like(out_ref)

    @pl.when(tile_start < total)
    def _():
        # Fold the tile offset into the (1, Tp) interval bounds (cheap) instead
        # of adding it to the (tile_m, Tp) iota (expensive).
        s = starts_ref[0] - tile_start                            # (1, Tp) int32
        e = ends_ref[0] - tile_start                              # (1, Tp) int32
        frames = jax.lax.broadcasted_iota(jnp.int32, (tile_m, Tp), 0)
        # One-hot frame->phoneme matrix: M[t, i] = 1 iff s[i] <= t < e[i].
        # Since s <= e always, (t < e) XOR (t < s)  ==  (t < e) AND NOT (t < s).
        expand_mat = ((frames < e) ^ (frames < s)).astype(x_ref.dtype)
        # Expansion on the MXU: (tile_m, Tp) @ (Tp, Dp) -> (tile_m, Dp).
        out_ref[0] = jnp.dot(expand_mat, x_ref[0],
                             preferred_element_type=jnp.float32
                             ).astype(out_ref.dtype)


def _round_up(n, m):
    return (n + m - 1) // m * m


def _pick_tile_m(max_len, cap, batch):
    """Pick the frame tile: a multiple of 8, as large as possible (<= cap),
    preferring a divisor of max_len (no post-kernel slice) while keeping enough
    grid steps (batch * n_tiles) for megacore sharding / writeback pipelining."""
    cap = max(8, cap - cap % 8)
    if max_len % 8 != 0:
        # Ragged max_len: must pad the frame axis anyway.
        return min(cap, _round_up(max_len, 8))
    divs = [t for t in range(8, min(cap, max_len) + 1, 8) if max_len % t == 0]
    divs.sort(reverse=True)
    for min_steps, min_tile in ((8, 128), (4, 64), (1, 8)):
        for t in divs:
            if t >= min_tile and batch * (max_len // t) >= min_steps:
                return t
    return divs[0]


def length_regulator(x, duration, max_len, *, tile_m=512, out_buffers=2):
    """x: (B, T, D) float; duration: (B, T) int; max_len: static python int.

    Returns (output (B, max_len, D) of x.dtype, mel_len (B,) int32).
    """
    B, T, D = x.shape
    dur_i = duration.astype(jnp.int32)

    # Hoisted scalar/prefix work (trivial XLA ops).
    mel_len = jnp.sum(dur_i, axis=1)                       # (B,) int32
    ends = jnp.cumsum(dur_i, axis=1)                       # inclusive prefix sum
    starts = ends - dur_i                                  # exclusive prefix sum

    # Pad T (matmul contraction dim) to a multiple of 128: padded phonemes get
    # the empty interval [0, 0), so their mask columns are exactly zero.
    Tp = _round_up(T, 128)
    if Tp != T:
        pad_t = Tp - T
        starts = jnp.pad(starts, ((0, 0), (0, pad_t)))
        ends = jnp.pad(ends, ((0, 0), (0, pad_t)))
    starts = starts.reshape(B, 1, Tp)
    ends = ends.reshape(B, 1, Tp)

    # Lane-dense hidden dim (multiple of 128) so output stores are unmasked.
    Dp = _round_up(D, 128)
    if Tp != T or Dp != D:
        xp = jnp.pad(x, ((0, 0), (0, Tp - T), (0, Dp - D)))
    else:
        xp = x

    # Frame-axis tiling. Prefer a tile that divides max_len so the kernel writes
    # exactly (B, max_len, Dp) and no post-kernel frame slice is needed.
    tm = _pick_tile_m(max_len, tile_m, B)
    padded_len = _round_up(max_len, tm)
    n_tiles = padded_len // tm

    itemsize = jnp.dtype(x.dtype).itemsize
    cost = pl.CostEstimate(
        flops=2 * B * padded_len * Tp * Dp,
        transcendentals=0,
        bytes_accessed=(B * Tp * Dp * itemsize             # x
                        + B * padded_len * Dp * itemsize   # out
                        + 2 * B * Tp * 4 + B * 4),          # starts/ends/mel_len
    )

    # Scoped-VMEM budget: x (double-buffered) + out buffers + starts/ends.
    vmem_need = (itemsize * Dp * (2 * Tp + max(2, out_buffers) * tm)
                 + 2 * 2 * Tp * 4)
    cp_kwargs = dict(dimension_semantics=("parallel", "parallel"))
    if vmem_need > (24 << 20):
        cp_kwargs["vmem_limit_bytes"] = min(2 * vmem_need, 64 << 20)

    out_spec_kwargs = {}
    if out_buffers > 2:
        # Extra output buffering if a profile shows exposed writeback DMA.
        out_spec_kwargs["pipeline_mode"] = pl.Buffered(out_buffers)

    out = pl.pallas_call(
        _length_regulator_kernel,
        grid=(B, n_tiles),  # frame-tile axis innermost: x block not re-DMA'd
        in_specs=[
            pl.BlockSpec((1, Tp, Dp), lambda b, m: (b, 0, 0)),
            pl.BlockSpec((1, 1, Tp), lambda b, m: (b, 0, 0)),
            pl.BlockSpec((1, 1, Tp), lambda b, m: (b, 0, 0)),
            pl.BlockSpec(memory_space=pltpu.MemorySpace.SMEM),
        ],
        out_specs=pl.BlockSpec((1, tm, Dp), lambda b, m: (b, m, 0),
                               **out_spec_kwargs),
        out_shape=jax.ShapeDtypeStruct((B, padded_len, Dp), x.dtype),
        compiler_params=pltpu.CompilerParams(**cp_kwargs),
        cost_estimate=cost,
    )(xp, starts, ends, mel_len)

    # No-op when max_len % 8 == 0 (tile divides max_len) and D % 128 == 0.
    if padded_len != max_len or Dp != D:
        out = out[:, :max_len, :D]
    return out, mel_len


if __name__ == "__main__":
    key = jax.random.PRNGKey(0)
    kx, kd = jax.random.split(key)

    B, T, D = 2, 8, 32
    x = jax.random.normal(kx, (B, T, D), dtype=jnp.float32)
    duration = jax.random.randint(kd, (B, T), 0, 6, dtype=jnp.int32)

    # max_len must cover the longest expanded sequence (T * max_dur = 40 here).
    max_len = 48

    out, mel_len = length_regulator(x, duration, max_len)
    jax.block_until_ready((out, mel_len))

    # Pure-numpy reference of the PyTorch semantics.
    xn = np.asarray(x)
    dn = np.asarray(duration)
    ref = np.zeros((B, max_len, D), np.float32)
    ref_len = dn.sum(axis=1).astype(np.int32)
    for b in range(B):
        expanded = np.repeat(xn[b], dn[b], axis=0)
        ref[b, : expanded.shape[0]] = expanded

    np.testing.assert_allclose(np.asarray(out), ref, rtol=0, atol=0)
    np.testing.assert_array_equal(np.asarray(mel_len), ref_len)
    print("KERNEL_OK")
</pallas_src>

<mosaic_0001>
module attributes {stable_mosaic.version = 11 : i64} {
  func.func @_length_regulator_kernel(%arg0: i32, %arg1: i32, %arg2: memref<1x128x128xf32, #tpu.memory_space<vmem>>, %arg3: memref<1x1x128xi32, #tpu.memory_space<vmem>>, %arg4: memref<1x1x128xi32, #tpu.memory_space<vmem>>, %arg5: memref<2xi32, #tpu.memory_space<smem>>, %arg6: memref<1x48x128xf32, #tpu.memory_space<vmem>>) attributes {dimension_semantics = [#tpu.dimension_semantics<parallel>, #tpu.dimension_semantics<parallel>], iteration_bounds = array<i64: 2, 1>, scalar_prefetch = 0 : i64, scratch_operands = 0 : i64, tpu.core_type = #tpu.core_type<tc>, window_params = [{transform_indices = @transform_0, window_bounds = array<i64: 1, 128, 128>}, {transform_indices = @transform_1, window_bounds = array<i64: 1, 1, 128>}, {transform_indices = @transform_2, window_bounds = array<i64: 1, 1, 128>}, {transform_indices = @transform_3, window_bounds = array<i64: 2>}, {transform_indices = @transform_4, window_bounds = array<i64: 1, 48, 128>}]} {
    %c48_i32 = arith.constant 48 : i32
    %0 = arith.muli %arg1, %c48_i32 : i32
    %1 = arith.index_cast %arg0 : i32 to index
    %2 = memref.load %arg5[%1] : memref<2xi32, #tpu.memory_space<smem>>
    %3 = arith.cmpi sge, %0, %2 : i32
    %4 = arith.extui %3 : i1 to i32
    %c0_i32 = arith.constant 0 : i32
    %5 = arith.cmpi ne, %4, %c0_i32 : i32
    scf.if %5 {
      %cst = arith.constant 0.000000e+00 : f32
      %9 = vector.broadcast %cst : f32 to vector<1x48x128xf32>
      %c0 = arith.constant 0 : index
      %c0_1 = arith.constant 0 : index
      %c0_2 = arith.constant 0 : index
      %10 = vector.load %arg6[%c0, %c0_1, %c0_2] : memref<1x48x128xf32, #tpu.memory_space<vmem>>, vector<1x48x128xf32>
      tpu.vector_store %arg6[%c0, %c0_1, %c0_2], %9 {strides = array<i32>} : memref<1x48x128xf32, #tpu.memory_space<vmem>>, vector<1x48x128xf32>,
    } else {
    }
    %6 = arith.cmpi slt, %0, %2 : i32
    %7 = arith.extui %6 : i1 to i32
    %c0_i32_0 = arith.constant 0 : i32
    %8 = arith.cmpi ne, %7, %c0_i32_0 : i32
    scf.if %8 {
      %c0 = arith.constant 0 : index
      %c0_1 = arith.constant 0 : index
      %c0_2 = arith.constant 0 : index
      %9 = vector.load %arg3[%c0, %c0_1, %c0_2] : memref<1x1x128xi32, #tpu.memory_space<vmem>>, vector<1x1x128xi32>
      %10 = vector.shape_cast %9 : vector<1x1x128xi32> to vector<1x128xi32>
      %11 = vector.broadcast %0 : i32 to vector<1x128xi32>
      %12 = arith.subi %10, %11 : vector<1x128xi32>
      %c0_3 = arith.constant 0 : index
      %c0_4 = arith.constant 0 : index
      %c0_5 = arith.constant 0 : index
      %13 = vector.load %arg4[%c0_3, %c0_4, %c0_5] : memref<1x1x128xi32, #tpu.memory_space<vmem>>, vector<1x1x128xi32>
      %14 = vector.shape_cast %13 : vector<1x1x128xi32> to vector<1x128xi32>
      %15 = vector.broadcast %0 : i32 to vector<1x128xi32>
      %16 = arith.subi %14, %15 : vector<1x128xi32>
      %17 = tpu.iota {dimensions = array<i32: 0>} : vector<48x128xi32>
      %18 = vector.broadcast %16 : vector<1x128xi32> to vector<48x128xi32>
      %19 = arith.cmpi slt, %17, %18 : vector<48x128xi32>
      %20 = vector.broadcast %12 : vector<1x128xi32> to vector<48x128xi32>
      %21 = arith.cmpi slt, %17, %20 : vector<48x128xi32>
      %22 = arith.xori %19, %21 : vector<48x128xi1>
      %23 = arith.extui %22 : vector<48x128xi1> to vector<48x128xi32>
      %24 = arith.sitofp %23 : vector<48x128xi32> to vector<48x128xf32>
      %c0_6 = arith.constant 0 : index
      %c0_7 = arith.constant 0 : index
      %c0_8 = arith.constant 0 : index
      %25 = vector.load %arg2[%c0_6, %c0_7, %c0_8] : memref<1x128x128xf32, #tpu.memory_space<vmem>>, vector<1x128x128xf32>
      %26 = vector.shape_cast %25 : vector<1x128x128xf32> to vector<128x128xf32>
      %cst = arith.constant dense<0.000000e+00> : vector<48x128xf32>
      %27 = tpu.matmul %24, %26, %cst {dimension_numbers = #tpu.dot_dimension_numbers<[1], [0], [0], [1], [0, 0, 1, 1], [], []>} : vector<48x128xf32>, vector<128x128xf32>, vector<48x128xf32> -> vector<48x128xf32>
      %c0_9 = arith.constant 0 : index
      %c0_10 = arith.constant 0 : index
      %c0_11 = arith.constant 0 : index
      %28 = vector.load %arg6[%c0_9, %c0_10, %c0_11] : memref<1x48x128xf32, #tpu.memory_space<vmem>>, vector<1x48x128xf32>
      %29 = vector.shape_cast %28 : vector<1x48x128xf32> to vector<48x128xf32>
      %30 = vector.shape_cast %27 : vector<48x128xf32> to vector<1x48x128xf32>
      tpu.vector_store %arg6[%c0_9, %c0_10, %c0_11], %30 {strides = array<i32>} : memref<1x48x128xf32, #tpu.memory_space<vmem>>, vector<1x48x128xf32>,
    } else {
    }
    return
  }
  func.func @transform_0(%arg0: i32, %arg1: i32) -> (i32, i32, i32) {
    %c0_i32 = arith.constant 0 : i32
    %c0_i32_0 = arith.constant 0 : i32
    %c0_i32_1 = arith.constant 0 : i32
    return %arg0, %c0_i32, %c0_i32_0 : i32, i32, i32
  }
  func.func @transform_1(%arg0: i32, %arg1: i32) -> (i32, i32, i32) {
    %c0_i32 = arith.constant 0 : i32
    %c0_i32_0 = arith.constant 0 : i32
    %c0_i32_1 = arith.constant 0 : i32
    return %arg0, %c0_i32, %c0_i32_0 : i32, i32, i32
  }
  func.func @transform_2(%arg0: i32, %arg1: i32) -> (i32, i32, i32) {
    %c0_i32 = arith.constant 0 : i32
    %c0_i32_0 = arith.constant 0 : i32
    %c0_i32_1 = arith.constant 0 : i32
    return %arg0, %c0_i32, %c0_i32_0 : i32, i32, i32
  }
  func.func @transform_3(%arg0: i32, %arg1: i32) -> i32 {
    %c0_i32 = arith.constant 0 : i32
    %c0_i32_0 = arith.constant 0 : i32
    return %c0_i32 : i32
  }
  func.func @transform_4(%arg0: i32, %arg1: i32) -> (i32, i32, i32) {
    %c0_i32 = arith.constant 0 : i32
    %c0_i32_0 = arith.constant 0 : i32
    return %arg0, %arg1, %c0_i32 : i32, i32, i32
  }
}

</mosaic_0001>

<bundles_post_ra>
// kernel: tpu_custom_call.1
= control target key start
LH: loop header
LB: loop body
LE: loop exit
PB: predicated region body
PF: predicated region fallthrough
CT: control target
= control target key end

     0   :  { %9 = vsyncpa [#allocation3], 0  ;;  %s1272_s0 = inlined_call_operand.hbm [shape: f32[2,128,128], index: 0, kind: input, shape index: {}]   ;;  %s1273_s1 = inlined_call_operand.vmem [shape: s32[2,1,128], index: 1, kind: input, shape index: {}]   ;;  %s1274_s2 = inlined_call_operand.vmem [shape: s32[2,1,128], index: 2, kind: input, shape index: {}]   ;;  %s1275_s3 = inlined_call_operand.vmem [shape: s32[2], index: 3, kind: input, shape index: {}]   ;;  %s1276_s4 = inlined_call_operand.hbm [shape: f32[2,48,128], index: 4, kind: output, shape index: {}]  }
   0x1   :  { %11 = vsyncpa [#allocation3 + $0x1], 0 }
   0x2   :  { %12 = vsyncpa [#allocation5], 0 }
   0x3   :  { %13 = vsyncpa [#allocation4], 0 }
   0x4   :  { %15 = vsyncpa [#allocation4 + $0x1], 0  ;;  %s978_s15 = smov 0   ;;  %s980_s16 = smov 0  }
   0x5   :  { %s982_s17 = smov 0   ;;  %s984_s18 = smov 0  }
   0x6   :  { %s986_s19 = smov 0   ;;  %s988_s20 = smov 0  }
   0x7 LB: > { %s586_s21 = sadd.s32 4294967295, %s942_s20   ;;  %s587_s22 = sadd.s32 4294967294, %s942_s20   ;;  %s942_s20 = sphi %s988_s20, %s21_s20   ;;  %s938_s19 = sphi %s986_s19, %s1299_s19   ;;  %s934_s18 = sphi %s984_s18, %s1298_s18   ;;  %s930_s17 = sphi %s982_s17, %s1297_s17   ;;  %s926_s16 = sphi %s980_s16, %s1296_s16   ;;  %s922_s15 = sphi %s978_s15, %s1295_s15  }
   0x8   : > { %s40_s23 = sadd.s32 1, %s930_s17  ;;  %p47_p0 = scmp.ne.s32.totalorder %s930_s17, %s926_s16 }
   0x9   : > { %p48_p1 = scmp.eq.s32.totalorder %s942_s20, 0  ;;  %p53_p2 = scmp.ne.s32.totalorder %s926_s16, %s922_s15 }
   0xa   : > { %p1016_p3 = scmp.eq.s32.totalorder %s586_s21, 0  ;;  %p152_p4 = scmp.eq.s32.totalorder %s586_s21, 1 }
   0xb   : > { %p1020_p5 = por %p48_p1, %p47_p0  ;;  %p158_p6 = scmp.eq.s32.totalorder %s587_s22, 1 }
   0xc   : > { %s1281_s24 = scalar_select %p1016_p3, 1, 0 }
   0xd   : > { %p1026_p7 = por %p1016_p3, %p53_p2  ;;  %p1030_p8 = por %p152_p4, %p47_p0 }
   0xe   : > { %p1034_p9 = por %p158_p6, %p53_p2  ;;  %p588_p10 = scmp.ge.s32.totalorder %s942_s20, 1 }
   0xf   : > { %s1283_s26 = scalar_select %p1026_p7, 1, 0 }
  0x10   : > { %s1284_s27 = scalar_select %p1030_p8, 1, 0 }
  0x11   : > { %s1285_s28 = scalar_select %p1034_p9, 1, 0 }
  0x12   : > { %p165_p11 = scmp.lt.s32.totalorder %s942_s20, 3  ;;  %s178_s5 = sshll.u32 %s1275_s3, 4  ;;  %s179_s5 = int_to_ptr.vmem [resolvable:$true] %s178_s5 }
  0x13   : > { %p753_p0 = scmp.lt.s32.totalorder %s942_s20, 2  ;;  %s33_s9 = sadd.s32 1, %s938_s19 }
  0x14   : > { %p1043_p12 = pnand %p588_p10, %p165_p11  ;;  %p1064_p6 = scmp.ge.s32.totalorder %s33_s9, 2 }
  0x15   : > { %p1053_p2 = pnand %p753_p0, %p1020_p5  ;;  %s189_s11 = sand.u32 1, %s930_s17  }
  0x16   : > { %p740_p1 = pneg %p1043_p12  ;;  %s811_s12 = scalar_lea.vmem %s179_s5, 16 }
  0x17   : > { %p812_p10 = scmp.ne.s32.totalorder %s179_s5, %s811_s12  ;;  %p819_p13 = scmp.lt.s32.totalorder %s179_s5, %s179_s5 }
  0x18   : > { %p1059_p4 = pnand %p740_p1, %p1016_p3  ;;  %p820_p9 = scmp.lt.s32.totalorder %s811_s12, %s811_s12 }
  0x1a   : > { %p813_p11 = pneg %p1059_p4  ;;  %p821_p8 = por %p820_p9, %p819_p13 }
  0x1c   : > { %p814_p5 = pnand %p813_p11, %p812_p10 }
  0x1e   : > { %p815_p0 = pneg %p814_p5 }
  0x20   : > { %p822_p1 = pnand %p821_p8, %p815_p0 }
  0x22   : > { %825 = shalt.err (!%p822_p1)
}
  0x23   : > { %s944_s13 = smov [#allocation6]   ;;  %s1301_s9 = smov (%p1064_p6, %s33_s9), 0 }
  0x24   : > { %743 = dma.vmem_to_smem (!%p1059_p4), %s179_s5, 16, %s944_s13, [#allocation5]  }
  0x25   : > { %s591_s14 = sshll.u32 %s189_s11, 7  ;;  %s37_s21 = ssub.s32 %s938_s19, %s1301_s9 }
  0x26   : > { %p38_p9 = scmp.eq.s32.totalorder %s37_s21, 0  ;;  %s618_s22 = sshll.u32 %s938_s19, 11 }
  0x27   : > { %s1083_s30 = scalar_lea.hbm %s1272_s0, %s618_s22  ;;  %s193_s8 = scalar_lea.vmem [#allocation2], %s591_s14 }
  0x28   : > { %s200_s12 = sshll.u32 %s193_s8, 4  ;;  %s1092_s10 = scalar_lea.sflag [#allocation3], %s189_s11  ;;  %s1090_s12 = int_to_ptr.vmem [resolvable:$true] %s200_s12 }
  0x29   : > { %s1088_s5 = scalar_select %p38_p9, %s930_s17, %s40_s23  }
  0x2a   : > { %s826_s13 = scalar_lea.hbm %s1083_s30, 2048  ;;  %p828_p13 = pneg %p1053_p2 }
  0x2b   : > { %p827_p8 = scmp.ne.s32.totalorder %s1083_s30, %s826_s13  ;;  %s831_s14 = scalar_lea.hbm %s1272_s0, 4096 }
  0x2c   : > { %p832_p10 = scmp.lt.u32.totalorder %s1083_s30, %s1272_s0  ;;  %p833_p11 = scmp.lt.u32.totalorder %s831_s14, %s826_s13 }
  0x2d   : > { %p829_p4 = pnand %p828_p13, %p827_p8  ;;  %p835_p0 = scmp.lt.u32.totalorder %s826_s13, %s1083_s30 }
  0x2e   : > { %p834_p5 = por %p833_p11, %p832_p10 }
  0x2f   : > { %p830_p6 = pneg %p829_p4 }
  0x30   : > { %p836_p1 = por %p835_p0, %p834_p5 }
  0x32   : > { %p837_p9 = pnand %p836_p1, %p830_p6 }
  0x34   : > { %840 = shalt.err (!%p837_p9)
}
  0x35   : > { %s841_s23 = scalar_lea.vmem %s1090_s12, 2048  ;;  %s945_s11 = smov [#allocation2]  }
  0x36   : > { %p842_p8 = scmp.ne.s32.totalorder %s1090_s12, %s841_s23  ;;  %s846_s8 = sshll.u32 %s945_s11, 4  ;;  %s847_s8 = int_to_ptr.vmem [resolvable:$false] %s846_s8 }
  0x37   : > { %s848_s21 = scalar_lea.vmem %s847_s8, 4096  ;;  %p849_p7 = scmp.lt.s32.totalorder %s1090_s12, %s847_s8 }
  0x38   : > { %p844_p4 = pnand %p842_p8, %p828_p13  ;;  %p850_p10 = scmp.lt.s32.totalorder %s848_s21, %s841_s23 }
  0x3a   : > { %p845_p3 = pneg %p844_p4  ;;  %p851_p11 = por %p850_p10, %p849_p7 }
  0x3c   : > { %p852_p5 = pnand %p851_p11, %p845_p3 }
  0x3e   : > { %855 = shalt.err (!%p852_p5)
}
  0x3f   : > { %s946_s13 = smov 128   ;;  %s947_s22 = smov 8  }
  0x40   : > { %747 = dma.hbm_to_vmem [thread:$0]  (!%p1053_p2), %s1083_s30, 2048, %s1090_s12, %s1092_s10, %s946_s13, %s946_s13, %s947_s22  }
  0x41   : > { %224 = sbr.rel (%p1043_p12) target bundleno = 374 (0x176), region = 36  ;;  %s1123_s14 = sand.u32 (!%p1043_p12), 1, %s926_s16  }
  0x42   : > { %s595_s25 = sshll.u32 (!%p1043_p12), %s1123_s14, 7  ;;  %s227_s29 = scalar_lea.sflag (!%p1043_p12), [#allocation3], %s1123_s14 }
  0x43   : > { %s1127_s23 = scalar_lea.vmem (!%p1043_p12), [#allocation2], %s595_s25  ;;  %p1290_p3 = scmp.ne.s32.totalorder (!%p1043_p12), %s1283_s26, 0 }
  0x48   : > { %909 = dma.done.wait (%p1290_p3), %s227_s29, 2048  }
  0x49   : > { %911 = vsyncadd (%p1290_p3), %s227_s29, 4294965248  ;;  %p1291_p7 = scmp.ne.s32.totalorder %s1281_s24, 0 }
  0x4b   : > { %913 = dma.done.wait (%p1291_p7), [#allocation5], 16  }
  0x4c   : > { %915 = vsyncadd (%p1291_p7), [#allocation5], 4294967280 }
  0x4d   : > { %239 = sfence }
  0x4e   : > { %s730_s6 = smul.u32 48, %s1123_s14  ;;  %p266_p12 = scmp.lt.s32.totalorder %s934_s18, 1 }
  0x4f   : > { %s274_s7 = sld [smem:[#allocation6 + %s934_s18]] }
  0x50   : > { %s1141_s30 = scalar_select %p266_p12, %s934_s18, 1 }
  0x51   : > { %s1151_s21 = scalar_lea.vmem [#allocation7], %s730_s6 }
  0x52   : > { %s268_s10 = scalar_lea.vmem %s1273_s1, %s1141_s30  ;;  %s271_s24 = scalar_lea.vmem %s1274_s2, %s1141_s30 }
  0x55   : > { %p598_p2 = scmp.gt.s32.totalorder %s274_s7, 0 }
  0x56   : > { %v948_v0 = vmov (!%p598_p2), 0.0  }
  0x57   : > { %278 = sbr.rel (%p598_p2) target bundleno = 94 (0x5e), region = 48  ;;  %279 = vst [vmem:[%s1151_s21] sm:$0xff] (!%p598_p2), %v948_v0  ;;  %280 = vst [vmem:[%s1151_s21 + $0x8] sm:$0xff] (!%p598_p2), %v948_v0 }
  0x58   : > { %281 = vst [vmem:[%s1151_s21 + $0x10] sm:$0xff] (!%p598_p2), %v948_v0  ;;  %282 = vst [vmem:[%s1151_s21 + $0x18] sm:$0xff] (!%p598_p2), %v948_v0 }
  0x59   : > { %283 = vst [vmem:[%s1151_s21 + $0x20] sm:$0xff] (!%p598_p2), %v948_v0  ;;  %284 = vst [vmem:[%s1151_s21 + $0x28] sm:$0xff] (!%p598_p2), %v948_v0 }
  0x5e PF: > { %p600_p13 = scmp.le.s32.totalorder %s274_s7, 0 }
  0x5f   : > { %v339_v1 = vld [vmem:[%s1127_s23] sm:$0xff] (!%p600_p13)  ;;  %v340_v2 = vld [vmem:[%s1127_s23 + $0x8] sm:$0xff] (!%p600_p13)  ;;  %v341_v3 = vld [vmem:[%s1127_s23 + $0x10] sm:$0xff] (!%p600_p13)  ;;  %v294_v4 = vlaneseq (!%p600_p13)  ;;  %v949_v20 = vmov (!%p600_p13), 1.0  }
  0x60   : > { %288 = sbr.rel (%p600_p13) target bundleno = 348 (0x15c), region = 52  ;;  %v682_v5 = vpack.c.bf16 (!%p600_p13), %v340_v2, %v339_v1  ;;  %v342_v6 = vld [vmem:[%s1127_s23 + $0x18] sm:$0xff] (!%p600_p13)  ;;  %v343_v8 = vld [vmem:[%s1127_s23 + $0x20] sm:$0xff] (!%p600_p13)  ;;  %v344_v9 = vld [vmem:[%s1127_s23 + $0x28] sm:$0xff] (!%p600_p13) }
  0x61   : > { %v686_v7 = vpack.c.bf16 (!%p600_p13), %v342_v6, %v341_v3  ;;  %v1165_v10 = vshrl.u32 (!%p600_p13), %v294_v4, 7  ;;  %v690_v12 = vpack.c.bf16 (!%p600_p13), %v344_v9, %v343_v8  ;;  %v1173_v13 = vld [vmem:[%s268_s10] ss:$0 sm:$0xff] (!%p600_p13)  ;;  %v345_v15 = vld [vmem:[%s1127_s23 + $0x30] sm:$0xff] (!%p600_p13)  ;;  %v346_v16 = vld [vmem:[%s1127_s23 + $0x38] sm:$0xff] (!%p600_p13) }
  0x62   : > { %714 = vmatprep.subr.bf16.mxu1 (!%p600_p13), %v682_v5  ;;  %683 = vmatprep.subr.bf16.mxu0 (!%p600_p13), %v682_v5  ;;  %v1180_v14 = vld [vmem:[%s271_s24] ss:$0 sm:$0xff] (!%p600_p13)  ;;  %v694_v17 = vpack.c.bf16 (!%p600_p13), %v346_v16, %v345_v15  ;;  %v348_v19 = vld [vmem:[%s1127_s23 + $0x48] sm:$0xff] (!%p600_p13)  ;;  %v349_v22 = vld [vmem:[%s1127_s23 + $0x50] sm:$0xff] (!%p600_p13) }
  0x63   : > { %722 = vmatpush3.bf16.msra.mxu1 (!%p600_p13), %v682_v5  ;;  %685 = vmatpush3.bf16.msra.mxu0 (!%p600_p13), %v682_v5  ;;  %v297_v11 = vadd.s32 (!%p600_p13), 16, %v1165_v10  ;;  %vm305_vm3 = vcmp.lt.s32.totalorder (!%p600_p13), %v1165_v10, %v1180_v14  ;;  %vm315_vm4 = vcmp.lt.s32.totalorder (!%p600_p13), %v1165_v10, %v1173_v13  ;;  %v347_v18 = vld [vmem:[%s1127_s23 + $0x40] sm:$0xff] (!%p600_p13)  ;;  %v350_v23 = vld [vmem:[%s1127_s23 + $0x58] sm:$0xff] (!%p600_p13)  ;;  %v352_v26 = vld [vmem:[%s1127_s23 + $0x68] sm:$0xff] (!%p600_p13)  ;;  %v298_v30 = vadd.s32 (!%p600_p13), 24, %v1165_v10 }
  0x64   : > { %715 = vmatprep.subr.bf16.mxu1 (!%p600_p13), %v686_v7  ;;  %687 = vmatprep.subr.bf16.mxu0 (!%p600_p13), %v686_v7  ;;  %vm321_vm5 = vmxor (!%p600_p13), %vm305_vm3, %vm315_vm4  ;;  %v698_v21 = vpack.c.bf16 (!%p600_p13), %v348_v19, %v347_v18  ;;  %v702_v24 = vpack.c.bf16 (!%p600_p13), %v350_v23, %v349_v22  ;;  %v351_v25 = vld [vmem:[%s1127_s23 + $0x60] sm:$0xff] (!%p600_p13)  ;;  %v353_v28 = vld [vmem:[%s1127_s23 + $0x70] sm:$0xff] (!%p600_p13)  ;;  %v296_v32 = vadd.s32 (!%p600_p13), 8, %v1165_v10  ;;  %v299_v33 = vadd.s32 (!%p600_p13), 32, %v1165_v10 }
  0x65   : > { %vm307_vm0 = vcmp.lt.s32.totalorder (!%p600_p13), %v297_v11, %v1180_v14  ;;  %vm317_vm1 = vcmp.lt.s32.totalorder (!%p600_p13), %v297_v11, %v1173_v13  ;;  %673 = vmatprep.mubr.msk.f32.mxu0 (!%p600_p13), %vm321_vm5, %v949_v20  ;;  %v706_v27 = vpack.c.bf16 (!%p600_p13), %v352_v26, %v351_v25  ;;  %v354_v29 = vld [vmem:[%s1127_s23 + $0x78] sm:$0xff] (!%p600_p13)  ;;  %vm308_vm6 = vcmp.lt.s32.totalorder (!%p600_p13), %v298_v30, %v1180_v14 }
  0x66   : > { %vm323_vm2 = vmxor (!%p600_p13), %vm307_vm0, %vm317_vm1  ;;  %v710_v31 = vpack.c.bf16 (!%p600_p13), %v354_v29, %v353_v28  ;;  %vm318_vm7 = vcmp.lt.s32.totalorder (!%p600_p13), %v298_v30, %v1173_v13  ;;  %vm306_vm8 = vcmp.lt.s32.totalorder (!%p600_p13), %v296_v32, %v1180_v14  ;;  %vm316_vm9 = vcmp.lt.s32.totalorder (!%p600_p13), %v296_v32, %v1173_v13 }
  0x67   : > { %723 = vmatpush3.bf16.msra.mxu1 %v686_v7  ;;  %689 = vmatpush3.bf16.msra.mxu0 %v686_v7  ;;  %v300_v34 = vadd.s32 40, %v1165_v10  ;;  %vm309_vm10 = vcmp.lt.s32.totalorder %v299_v33, %v1180_v14  ;;  %vm319_vm11 = vcmp.lt.s32.totalorder %v299_v33, %v1173_v13  ;;  %vm324_vm12 = vmxor %vm308_vm6, %vm318_vm7 }
  0x68   : > { %716 = vmatprep.subr.bf16.mxu1 %v690_v12  ;;  %691 = vmatprep.subr.bf16.mxu0 %v690_v12  ;;  %vm322_vm13 = vmxor %vm306_vm8, %vm316_vm9 }
  0x69   : > { %676 = vmatprep.mubr.msk.f32.mxu1 %vm323_vm2, %v949_v20  ;;  %vm325_vm14 = vmxor %vm309_vm10, %vm319_vm11  ;;  %vm310_vm15 = vcmp.lt.s32.totalorder %v300_v34, %v1180_v14  ;;  %vm320_vm0 = vcmp.lt.s32.totalorder %v300_v34, %v1173_v13 }
  0x6a   : > { %vm326_vm1 = vmxor %vm310_vm15, %vm320_vm0 }
  0x6b   : > { %724 = vmatpush3.bf16.msra.mxu1 %v690_v12  ;;  %693 = vmatpush3.bf16.msra.mxu0 %v690_v12 }
  0x6c   : > { %717 = vmatprep.subr.bf16.mxu1 %v694_v17  ;;  %695 = vmatprep.subr.bf16.mxu0 %v694_v17 }
  0x6f   : > { %725 = vmatpush3.bf16.msra.mxu1 %v694_v17  ;;  %697 = vmatpush3.bf16.msra.mxu0 %v694_v17 }
  0x70   : > { %718 = vmatprep.subr.bf16.mxu1 %v698_v21  ;;  %699 = vmatprep.subr.bf16.mxu0 %v698_v21 }
  0x73   : > { %726 = vmatpush3.bf16.msra.mxu1 %v698_v21  ;;  %701 = vmatpush3.bf16.msra.mxu0 %v698_v21 }
  0x74   : > { %719 = vmatprep.subr.bf16.mxu1 %v702_v24  ;;  %703 = vmatprep.subr.bf16.mxu0 %v702_v24 }
  0x77   : > { %727 = vmatpush3.bf16.msra.mxu1 %v702_v24  ;;  %705 = vmatpush3.bf16.msra.mxu0 %v702_v24 }
  0x78   : > { %720 = vmatprep.subr.bf16.mxu1 %v706_v27  ;;  %707 = vmatprep.subr.bf16.mxu0 %v706_v27 }
  0x7b   : > { %728 = vmatpush3.bf16.msra.mxu1 %v706_v27  ;;  %709 = vmatpush3.bf16.msra.mxu0 %v706_v27 }
  0x7c   : > { %721 = vmatprep.subr.bf16.mxu1 %v710_v31  ;;  %711 = vmatprep.subr.bf16.mxu0 %v710_v31 }
  0x7f   : > { %729 = vmatpush3.bf16.msra.mxu1 %v710_v31  ;;  %713 = vmatpush3.bf16.msra.mxu0 %v710_v31 }
  0x82   : > { %677 = vmatmul.mubr.msk.f32.vlgmr.msra.gmra.mrb[0].mxu1 %vm324_vm12, %v949_v20  ;;  %674 = vmatmul.mubr.msk.f32.vlgmr.msra.gmra.mrb[0].mxu0 %vm322_vm13, %v949_v20 }
  0x83   : > { %679 = vmatprep.mubr.msk.f32.mxu1 %vm325_vm14, %v949_v20 }
  0x86   : > { %680 = vmatmul.mubr.msk.f32.gmra.mrb[2].mxu1 %vm326_vm1, %v949_v20 }
 0x155   : > { %v678_v35 = vpop.f32.mrb[0].mxu1  ;;  %v675_v36 = vpop.f32.mrb[0].mxu0 }
 0x156   : > { %453 = vst [vmem:[%s1151_s21 + $0x18] sm:$0xff] %v678_v35  ;;  %v431_v37 = vpop.f32.mrb[1].mxu1  ;;  %451 = vst [vmem:[%s1151_s21 + $0x8] sm:$0xff] %v675_v36  ;;  %v421_v38 = vpop.f32.mrb[1].mxu0 }
 0x157   : > { %452 = vst [vmem:[%s1151_s21 + $0x10] sm:$0xff] %v431_v37  ;;  %450 = vst [vmem:[%s1151_s21] sm:$0xff] %v421_v38 }
 0x159   : > { %v681_v39 = vpop.f32.mrb[2].mxu1 }
 0x15a   : > { %455 = vst [vmem:[%s1151_s21 + $0x28] sm:$0xff] %v681_v39  ;;  %v441_v40 = vpop.f32.mrb[3].mxu1 }
 0x15b   : > { %454 = vst [vmem:[%s1151_s21 + $0x20] sm:$0xff] %v441_v40 }
 0x15c PF: > { %s731_s23 = smul.u32 768, %s934_s18  ;;  %s472_s6 = sshll.u32 %s1151_s21, 4  ;;  %s1223_s6 = int_to_ptr.vmem [resolvable:$true] %s472_s6 }
 0x15d   : > { %s457_s26 = scalar_lea.sflag [#allocation4], %s1123_s14  ;;  %s856_s10 = scalar_lea.vmem %s1223_s6, 768 }
 0x15e   : > { %s1221_s12 = scalar_lea.hbm %s1276_s4, %s731_s23  ;;  %p857_p6 = scmp.ne.s32.totalorder %s1223_s6, %s856_s10 }
 0x15f   : > { %p1292_p0 = scmp.ne.s32.totalorder %s1284_s27, 0  ;;  %s950_s11 = smov [#allocation7]  }
 0x160   : > { %s860_s8 = sshll.u32 %s950_s11, 4  ;;  %s861_s8 = int_to_ptr.vmem [resolvable:$false] %s860_s8 }
 0x161   : > { %p858_p1 = pnand %p857_p6, %p1292_p0  ;;  %s862_s18 = scalar_lea.vmem %s861_s8, 1536 }
 0x162   : > { %p863_p8 = scmp.lt.s32.totalorder %s1223_s6, %s861_s8  ;;  %p864_p4 = scmp.lt.s32.totalorder %s862_s18, %s856_s10 }
 0x163   : > { %p859_p9 = pneg %p858_p1 }
 0x164   : > { %p865_p10 = por %p864_p4, %p863_p8 }
 0x166   : > { %p866_p11 = pnand %p865_p10, %p859_p9 }
 0x168   : > { %869 = shalt.err (!%p866_p11)
}
 0x169   : > { %s870_s24 = scalar_lea.hbm %s1221_s12, 768  ;;  %s874_s22 = scalar_lea.hbm %s1276_s4, 1536 }
 0x16a   : > { %p871_p5 = scmp.ne.s32.totalorder %s1221_s12, %s870_s24  ;;  %p875_p12 = scmp.lt.u32.totalorder %s1221_s12, %s1276_s4 }
 0x16b   : > { %p876_p2 = scmp.lt.u32.totalorder %s874_s22, %s870_s24  ;;  %p878_p6 = scmp.lt.u32.totalorder %s870_s24, %s1221_s12 }
 0x16c   : > { %p872_p3 = pnand %p871_p5, %p1292_p0 }
 0x16d   : > { %p877_p13 = por %p876_p2, %p875_p12 }
 0x16e   : > { %p873_p7 = pneg %p872_p3 }
 0x16f   : > { %p879_p1 = por %p878_p6, %p877_p13 }
 0x171   : > { %p880_p9 = pnand %p879_p1, %p873_p7 }
 0x173   : > { %883 = shalt.err (!%p880_p9)
}
 0x174   : > { %s951_s23 = smov 128   ;;  %s952_s7 = smov 8  }
 0x175   : > { %738 = dma.vmem_to_hbm [thread:$0]  (%p1292_p0), %s1223_s6, 768, %s1221_s12, %s457_s26, %s951_s23, %s951_s23, %s952_s7  }
 0x176 PF: > { %s487_s30 = sand.u32 1, %s922_s15   ;;  %p1293_p8 = scmp.ne.s32.totalorder %s1285_s28, 0 }
 0x177   : > { %p1294_p4 = scmp.ge.s32.totalorder %s942_s20, 2  ;;  %s488_s10 = scalar_lea.sflag [#allocation4], %s487_s30 }
 0x179   : > { %p749_p10 = pnand %p1294_p4, %p1293_p8 }
 0x17b   : > { %917 = dma.done.wait (!%p749_p10), %s488_s10, 768  }
 0x17c   : > { %919 = vsyncadd (!%p749_p10), %s488_s10, 4294966528  ;;  %s21_s20 = sadd.s32 1, %s942_s20   ;;  %s1295_s15 = smov %s926_s16 }
 0x17d   : > { %p18_p11 = scmp.ge.s32.totalorder %s21_s20, 4   ;;  %s1296_s16 = smov %s930_s17 }
 0x17e   : > { %s1297_s17 = smov %s1088_s5  ;;  %s1298_s18 = smov %s938_s19 }
 0x17f   : > { %s1299_s19 = smov %s1301_s9  ;;  %20 = sbr.rel (!%p18_p11) target bundleno = 7 (0x7), region = 100 }
 0x186   :  { %493 = vsyncpa [#allocation3], 1 }
 0x187   :  { %495 = vsyncpa [#allocation3 + $0x1], 1 }
 0x188   :  { %496 = vsyncpa [#allocation4], 1 }
 0x189   :  { %498 = vsyncpa [#allocation4 + $0x1], 1 }
 0x18a   :  { %499 = vsyncpa [#allocation5], 1 }
 0x18b   :  { %501 = vsyncpa [#allocation5 + $0x1], 1 }

</bundles_post_ra>
